<compile_context>
chip_gen: v7x
topology: tpu7x:2x2x1
jax: 0.10.0
libtpu: 0.0.40
codegen_flags: <defaults>
</compile_context>

<pallas_src>
import functools

import jax
import jax.numpy as jnp
from jax.experimental import pallas as pl
from jax.experimental.pallas import tpu as pltpu


# ----------------------------------------------------------------------------
# Fused conv-chain kernel: a sequence of 3x3 dilated convs (+bias, +ReLU) with
# the activation resident in VMEM and weights streamed per layer from HBM.
# ----------------------------------------------------------------------------
def _conv_chain_kernel(*args, specs, N, H, W, dmax):
    L = len(specs)
    x_ref = args[0]                         # (N, H, W, Cin0) f32, VMEM
    w_hbm = args[1:1 + L]                   # per-layer (9*Cin, Cout) bf16, HBM
    b_refs = args[1 + L:1 + 2 * L]          # per-layer (1, Cout) f32, VMEM
    o_ref = args[1 + 2 * L]                 # (N, H, W, Cout_last)
    wbufs = args[2 + 2 * L:2 + 3 * L]       # VMEM weight scratch, exact shapes
    xpad = args[2 + 3 * L]                  # (N, H+2dmax, W+2dmax, Cin_max) f32
    sem = args[3 + 3 * L]                   # DMA semaphores, one per layer

    M = N * H * W

    # Kick off every weight DMA now; wait right before each layer's matmul so
    # weight fetch overlaps earlier layers' compute.
    copies = []
    for li in range(L):
        cp = pltpu.make_async_copy(w_hbm[li], wbufs[li], sem.at[li])
        cp.start()
        copies.append(cp)

    # Zero the padded scratch once.  The halo frame is never written afterwards
    # and the interior is fully rewritten by every layer before it is read.
    xpad[...] = jnp.zeros_like(xpad)

    y = x_ref[...].astype(jnp.float32)                       # (N, H, W, Cin0)
    for li, (cin, cout, d, relu) in enumerate(specs):
        xpad[:, dmax:dmax + H, dmax:dmax + W, 0:cin] = y
        copies[li].wait()

        def tap_origin(t, _d=d):
            ky, kx = t // 3, t % 3
            return dmax - _d + ky * _d, dmax - _d + kx * _d

        if cin == 1:
            # Head conv: a K=1 matmul wastes the MXU -- do it on the VPU.
            w = wbufs[li][...].astype(jnp.float32)           # (9, Cout)
            acc = jnp.zeros((M, cout), jnp.float32)
            for t in range(9):
                r0, c0 = tap_origin(t)
                patch = xpad[:, r0:r0 + H, c0:c0 + W, 0:1].reshape(M, 1)
                acc = acc + patch * w[t:t + 1, :]
        elif cin % 128 == 0:
            # Deep layers (tiny M): single im2col matmul, K = 9*Cin.
            cols = []
            for t in range(9):
                r0, c0 = tap_origin(t)
                cols.append(
                    xpad[:, r0:r0 + H, c0:c0 + W, 0:cin].reshape(M, cin))
            slab = jnp.concatenate(cols, axis=-1).astype(jnp.bfloat16)
            acc = jnp.dot(slab, wbufs[li][...],
                          preferred_element_type=jnp.float32)
        else:
            # Cin = 64 (or other small Cin) layers: 9 accumulating taps.
            acc = jnp.zeros((M, cout), jnp.float32)
            for t in range(9):
                r0, c0 = tap_origin(t)
                patch = xpad[:, r0:r0 + H, c0:c0 + W, 0:cin].reshape(M, cin)
                acc = acc + jnp.dot(patch.astype(jnp.bfloat16),
                                    wbufs[li][t * cin:(t + 1) * cin, :],
                                    preferred_element_type=jnp.float32)

        acc = acc + b_refs[li][...]                          # (1,Cout) broadcast
        if relu:
            acc = jnp.maximum(acc, 0.0)
        y = acc.reshape(N, H, W, cout)

    o_ref[...] = y.astype(o_ref.dtype)


def conv_chain(x, weights, biases, specs):
    """Run a chain of 3x3 dilated convs (+bias, +optional ReLU) in one kernel.

    x:       (N, H, W, Cin0) float32 NHWC
    weights: list of bf16 arrays, weights[i].shape == (9*Cin_i, Cout_i)
    biases:  list of f32 arrays, biases[i].shape == (1, Cout_i)
    specs:   list of (cin, cout, dilation, relu)
    """
    N, H, W, cin0 = x.shape
    L = len(specs)
    assert cin0 == specs[0][0], (cin0, specs[0])
    for (cin, cout, _, _), w, b in zip(specs, weights, biases):
        assert w.shape == (9 * cin, cout), (w.shape, cin, cout)
        assert w.dtype == jnp.bfloat16, w.dtype
        assert b.shape == (1, cout), b.shape
    for prev, cur in zip(specs[:-1], specs[1:]):
        assert prev[1] == cur[0], (prev, cur)

    dmax = max(s[2] for s in specs)
    cin_max = max(s[0] for s in specs)
    cout_last = specs[-1][1]

    kern = functools.partial(_conv_chain_kernel, specs=tuple(specs),
                             N=N, H=H, W=W, dmax=dmax)

    in_specs = [pl.BlockSpec((N, H, W, cin0), lambda i: (0, 0, 0, 0))]
    in_specs += [pl.BlockSpec(memory_space=pl.ANY)] * L
    in_specs += [pl.BlockSpec((1, c), lambda i: (0, 0))
                 for (_, c, _, _) in specs]
    out_spec = pl.BlockSpec((N, H, W, cout_last), lambda i: (0, 0, 0, 0))

    scratch = [pltpu.VMEM((9 * cin, cout), jnp.bfloat16)
               for (cin, cout, _, _) in specs]
    scratch += [
        pltpu.VMEM((N, H + 2 * dmax, W + 2 * dmax, cin_max), jnp.float32),
        pltpu.SemaphoreType.DMA((L,)),
    ]

    # Size the VMEM limit from the real buffers (+ slack for compiler temps).
    w_bytes = sum(int(w.nbytes) for w in weights)
    xpad_bytes = N * (H + 2 * dmax) * (W + 2 * dmax) * cin_max * 4
    io_bytes = (int(x.nbytes) + N * H * W * cout_last * 4
                + sum(int(b.nbytes) for b in biases))
    slab_bytes = N * H * W * 9 * cin_max * 8
    vmem_limit = int(w_bytes + xpad_bytes + 2 * io_bytes + slab_bytes
                     + 8 * 1024 * 1024)

    return pl.pallas_call(
        kern,
        out_shape=jax.ShapeDtypeStruct((N, H, W, cout_last), jnp.float32),
        grid_spec=pltpu.PrefetchScalarGridSpec(
            num_scalar_prefetch=0,
            grid=(1,),
            in_specs=in_specs,
            out_specs=out_spec,
            scratch_shapes=scratch),
        compiler_params=pltpu.CompilerParams(
            dimension_semantics=("arbitrary",),
            vmem_limit_bytes=vmem_limit),
    )(x, *weights, *biases)


def conv3x3(x, w_hwio, b, *, dilation=1, relu=False):
    """Single spatially-preserving 3x3 conv (padding = dilation). For testing."""
    _, _, cin, cout = w_hwio.shape
    w = w_hwio.reshape(9 * cin, cout).astype(jnp.bfloat16)
    b2 = b.reshape(1, cout).astype(jnp.float32)
    return conv_chain(x, [w], [b2], [(cin, cout, dilation, relu)])


# ----------------------------------------------------------------------------
# Haar DWT / IWT (pure data movement; plain-JAX glue between fused levels).
# ----------------------------------------------------------------------------
def dwt(x):  # NHWC
    x01 = x[:, 0::2, :, :] / 2
    x02 = x[:, 1::2, :, :] / 2
    x1 = x01[:, :, 0::2, :]
    x2 = x02[:, :, 0::2, :]
    x3 = x01[:, :, 1::2, :]
    x4 = x02[:, :, 1::2, :]
    ll = x1 + x2 + x3 + x4
    hl = -x1 - x2 + x3 + x4
    lh = -x1 + x2 - x3 + x4
    hh = x1 - x2 - x3 + x4
    return jnp.concatenate([ll, hl, lh, hh], axis=-1)


def iwt(x):  # NHWC
    N, H, W, C = x.shape
    co = C // 4
    x1 = x[..., 0 * co:1 * co] / 2
    x2 = x[..., 1 * co:2 * co] / 2
    x3 = x[..., 2 * co:3 * co] / 2
    x4 = x[..., 3 * co:4 * co] / 2
    h = jnp.zeros((N, 2 * H, 2 * W, co), x.dtype)
    h = h.at[:, 0::2, 0::2, :].set(x1 - x2 - x3 + x4)
    h = h.at[:, 1::2, 0::2, :].set(x1 - x2 + x3 - x4)
    h = h.at[:, 0::2, 1::2, :].set(x1 + x2 - x3 - x4)
    h = h.at[:, 1::2, 1::2, :].set(x1 + x2 + x3 + x4)
    return h


# ----------------------------------------------------------------------------
# MWCNN parameters + forward.
# ----------------------------------------------------------------------------
# name, cin, cout, dilation, relu
_CONV_SPECS = [
    ("head",     1,    64,   1, True),      # BBlock(1, 64)
    ("d_l0_0",   64,   64,   2, True),      # DBlock(64, 64)
    ("d_l0_1",   64,   64,   1, True),
    ("d_l1_0",   256,  128,  1, True),      # BBlock(256, 128)
    ("d_l1_1",   128,  128,  2, True),      # DBlock(128, 128)
    ("d_l1_2",   128,  128,  1, True),
    ("d_l2_0",   512,  256,  1, True),      # BBlock(512, 256)
    ("d_l2_1",   256,  256,  2, True),      # DBlock(256, 256)
    ("d_l2_2",   256,  256,  1, True),
    ("pro_l3_0", 1024, 512,  1, True),      # BBlock(1024, 512)
    ("pro_l3_1", 512,  512,  2, True),      # DBlock(512, 512, two=3)
    ("pro_l3_2", 512,  512,  3, True),
    ("pro_l3_3", 512,  512,  3, True),      # DBlock(512, 512, one=3, two=2)
    ("pro_l3_4", 512,  512,  2, True),
    ("pro_l3_5", 512,  1024, 1, True),      # BBlock(512, 1024)
    ("i_l2_0",   256,  256,  2, True),      # DBlock(256, 256)
    ("i_l2_1",   256,  256,  1, True),
    ("i_l2_2",   256,  512,  1, True),      # BBlock(256, 512)
    ("i_l1_0",   128,  128,  2, True),      # DBlock(128, 128)
    ("i_l1_1",   128,  128,  1, True),
    ("i_l1_2",   128,  256,  1, True),      # BBlock(128, 256)
    ("i_l0_0",   64,   64,   2, True),      # DBlock(64, 64)
    ("i_l0_1",   64,   64,   1, True),
    ("tail",     64,   1,    1, False),     # conv(64, 1) -- no activation
]
_SPEC_BY_NAME = {s[0]: s for s in _CONV_SPECS}

_LEVELS = {
    "enc0": ["head", "d_l0_0", "d_l0_1"],
    "enc1": ["d_l1_0", "d_l1_1", "d_l1_2"],
    "enc2": ["d_l2_0", "d_l2_1", "d_l2_2"],
    "pro3": ["pro_l3_0", "pro_l3_1", "pro_l3_2",
             "pro_l3_3", "pro_l3_4", "pro_l3_5"],
    "dec2": ["i_l2_0", "i_l2_1", "i_l2_2"],
    "dec1": ["i_l1_0", "i_l1_1", "i_l1_2"],
    "dec0": ["i_l0_0", "i_l0_1", "tail"],
}


def init_params(key):
    params = {}
    for name, cin, cout, _, _ in _CONV_SPECS:
        key, kw, kb = jax.random.split(key, 3)
        fan_in = 9 * cin
        w = (jax.random.normal(kw, (3, 3, cin, cout), jnp.float32)
             / jnp.sqrt(float(fan_in)))
        params[name + "_w"] = w.reshape(9 * cin, cout).astype(jnp.bfloat16)
        params[name + "_b"] = 0.01 * jax.random.normal(kb, (1, cout), jnp.float32)
    return params


def _run_level(x, params, names):
    specs = [tuple(_SPEC_BY_NAME[n][1:]) for n in names]    # (cin,cout,d,relu)
    ws = [params[n + "_w"] for n in names]
    bs = [params[n + "_b"] for n in names]
    return conv_chain(x, ws, bs, specs)


def mwcnn_forward(params, x_nchw):
    x = jnp.transpose(x_nchw, (0, 2, 3, 1))                  # NCHW -> NHWC
    x0 = _run_level(x, params, _LEVELS["enc0"])              # (N,16,16, 64)
    x1 = _run_level(dwt(x0), params, _LEVELS["enc1"])        # (N, 8, 8,128)
    x2 = _run_level(dwt(x1), params, _LEVELS["enc2"])        # (N, 4, 4,256)
    x_ = iwt(_run_level(dwt(x2), params, _LEVELS["pro3"])) + x2
    x_ = iwt(_run_level(x_, params, _LEVELS["dec2"])) + x1
    x_ = iwt(_run_level(x_, params, _LEVELS["dec1"])) + x0
    out = _run_level(x_, params, _LEVELS["dec0"]) + x        # (N,16,16, 1)
    return jnp.transpose(out, (0, 3, 1, 2))                  # NHWC -> NCHW


# ----------------------------------------------------------------------------
if __name__ == "__main__":
    key = jax.random.PRNGKey(0)
    kp, kx = jax.random.split(key)
    params = init_params(kp)
    x = jax.random.normal(kx, (2, 1, 16, 16), jnp.float32)   # NCHW, nColor=1

    # Sanity check of the fused conv machinery vs. XLA's dilated conv.
    xc = jax.random.normal(jax.random.PRNGKey(1), (2, 8, 8, 32), jnp.float32)
    wc = 0.1 * jax.random.normal(jax.random.PRNGKey(2), (3, 3, 32, 64), jnp.float32)
    bc = jax.random.normal(jax.random.PRNGKey(3), (64,), jnp.float32)
    got = conv3x3(xc, wc, bc, dilation=2, relu=True)
    # Reference with the same bf16 rounding of activations and weights.
    xr = xc.astype(jnp.bfloat16).astype(jnp.float32)
    wr = wc.astype(jnp.bfloat16).astype(jnp.float32)
    ref = jax.lax.conv_general_dilated(
        xr, wr, window_strides=(1, 1), padding=((2, 2), (2, 2)),
        rhs_dilation=(2, 2), dimension_numbers=("NHWC", "HWIO", "NHWC"))
    ref = jnp.maximum(ref + bc, 0.0)
    assert jnp.allclose(got, ref, rtol=2e-2, atol=2e-2), \
        float(jnp.max(jnp.abs(got - ref)))

    fwd = jax.jit(mwcnn_forward)
    y = jax.block_until_ready(fwd(params, x))
    assert y.shape == x.shape, y.shape
    assert bool(jnp.all(jnp.isfinite(y)))
    print("KERNEL_OK")
</pallas_src>

<mosaic_0001>
module attributes {stable_mosaic.version = 11 : i64} {
  func.func @_conv_chain_kernel(%arg0: i32, %arg1: memref<2x8x8x32xf32, #tpu.memory_space<vmem>>, %arg2: memref<288x64xbf16, #tpu.memory_space<any>>, %arg3: memref<1x64xf32, #tpu.memory_space<vmem>>, %arg4: memref<2x8x8x64xf32, #tpu.memory_space<vmem>>, %arg5: memref<288x64xbf16, #tpu.memory_space<vmem>>, %arg6: memref<2x12x12x32xf32, #tpu.memory_space<vmem>>, %arg7: memref<1x!tpu.dma_semaphore, #tpu.memory_space<semaphore_mem>>) attributes {dimension_semantics = [#tpu.dimension_semantics<arbitrary>], iteration_bounds = array<i64: 1>, scalar_prefetch = 0 : i64, scratch_operands = 3 : i64, tpu.core_type = #tpu.core_type<tc>, window_params = [{pipeline_mode = #tpu.pipeline_mode<synchronous>, transform_indices = @transform_0, window_bounds = array<i64: 2, 8, 8, 32>}, {}, {pipeline_mode = #tpu.pipeline_mode<synchronous>, transform_indices = @transform_2, window_bounds = array<i64: 1, 64>}, {pipeline_mode = #tpu.pipeline_mode<synchronous>, transform_indices = @transform_3, window_bounds = array<i64: 2, 8, 8, 64>}]} {
    %c0_i32 = arith.constant 0 : i32
    %0 = tpu.memref_slice %arg7[%c0_i32] : memref<1x!tpu.dma_semaphore, #tpu.memory_space<semaphore_mem>> -> memref<1x!tpu.dma_semaphore, #tpu.memory_space<semaphore_mem>>
    %1 = tpu.memref_squeeze %0 : memref<1x!tpu.dma_semaphore, #tpu.memory_space<semaphore_mem>> -> memref<!tpu.dma_semaphore, #tpu.memory_space<semaphore_mem>>
    tpu.enqueue_dma source(%arg2 : memref<288x64xbf16, #tpu.memory_space<any>>) target(%arg5 : memref<288x64xbf16, #tpu.memory_space<vmem>>) target_semaphore(%1 : memref<!tpu.dma_semaphore, #tpu.memory_space<semaphore_mem>>)
    %cst = arith.constant 0.000000e+00 : f32
    %2 = vector.broadcast %cst : f32 to vector<2x12x12x32xf32>
    %c0 = arith.constant 0 : index
    %c0_0 = arith.constant 0 : index
    %c0_1 = arith.constant 0 : index
    %c0_2 = arith.constant 0 : index
    %3 = vector.load %arg6[%c0, %c0_0, %c0_1, %c0_2] : memref<2x12x12x32xf32, #tpu.memory_space<vmem>>, vector<2x12x12x32xf32>
    tpu.vector_store %arg6[%c0, %c0_0, %c0_1, %c0_2], %2 {strides = array<i32>} : memref<2x12x12x32xf32, #tpu.memory_space<vmem>>, vector<2x12x12x32xf32>,
    %c0_3 = arith.constant 0 : index
    %c0_4 = arith.constant 0 : index
    %c0_5 = arith.constant 0 : index
    %c0_6 = arith.constant 0 : index
    %4 = vector.load %arg1[%c0_3, %c0_4, %c0_5, %c0_6] : memref<2x8x8x32xf32, #tpu.memory_space<vmem>>, vector<2x8x8x32xf32>
    %c0_7 = arith.constant 0 : index
    %c2 = arith.constant 2 : index
    %c2_8 = arith.constant 2 : index
    %c0_9 = arith.constant 0 : index
    %5 = vector.load %arg6[%c0_7, %c2, %c2_8, %c0_9] : memref<2x12x12x32xf32, #tpu.memory_space<vmem>>, vector<2x8x8x32xf32>
    tpu.vector_store %arg6[%c0_7, %c2, %c2_8, %c0_9], %4 {strides = array<i32>} : memref<2x12x12x32xf32, #tpu.memory_space<vmem>>, vector<2x8x8x32xf32>,
    %c0_i32_10 = arith.constant 0 : i32
    %6 = tpu.memref_slice %arg7[%c0_i32_10] : memref<1x!tpu.dma_semaphore, #tpu.memory_space<semaphore_mem>> -> memref<1x!tpu.dma_semaphore, #tpu.memory_space<semaphore_mem>>
    %7 = tpu.memref_squeeze %6 : memref<1x!tpu.dma_semaphore, #tpu.memory_space<semaphore_mem>> -> memref<!tpu.dma_semaphore, #tpu.memory_space<semaphore_mem>>
    tpu.wait_dma2 semaphore(%7 : memref<!tpu.dma_semaphore, #tpu.memory_space<semaphore_mem>>) src(%arg2 : memref<288x64xbf16, #tpu.memory_space<any>>) dst(%arg5 : memref<288x64xbf16, #tpu.memory_space<vmem>>)
    %cst_11 = arith.constant 0.000000e+00 : f32
    %8 = vector.broadcast %cst_11 : f32 to vector<128x64xf32>
    %c0_12 = arith.constant 0 : index
    %c0_13 = arith.constant 0 : index
    %c0_14 = arith.constant 0 : index
    %c0_15 = arith.constant 0 : index
    %9 = vector.load %arg6[%c0_12, %c0_13, %c0_14, %c0_15] : memref<2x12x12x32xf32, #tpu.memory_space<vmem>>, vector<2x8x8x32xf32>
    %10 = vector.shape_cast %9 : vector<2x8x8x32xf32> to vector<128x32xf32>
    %11 = arith.truncf %10 : vector<128x32xf32> to vector<128x32xbf16>
    %c0_16 = arith.constant 0 : index
    %c0_17 = arith.constant 0 : index
    %12 = vector.load %arg5[%c0_16, %c0_17] : memref<288x64xbf16, #tpu.memory_space<vmem>>, vector<32x64xbf16>
    %cst_18 = arith.constant dense<0.000000e+00> : vector<128x64xf32>
    %13 = tpu.matmul %11, %12, %cst_18 {dimension_numbers = #tpu.dot_dimension_numbers<[1], [0], [0], [1], [0, 0, 1, 1], [], []>} : vector<128x32xbf16>, vector<32x64xbf16>, vector<128x64xf32> -> vector<128x64xf32>
    %14 = arith.addf %8, %13 : vector<128x64xf32>
    %c0_19 = arith.constant 0 : index
    %c0_20 = arith.constant 0 : index
    %c2_21 = arith.constant 2 : index
    %c0_22 = arith.constant 0 : index
    %15 = vector.load %arg6[%c0_19, %c0_20, %c2_21, %c0_22] : memref<2x12x12x32xf32, #tpu.memory_space<vmem>>, vector<2x8x8x32xf32>
    %16 = vector.shape_cast %15 : vector<2x8x8x32xf32> to vector<128x32xf32>
    %17 = arith.truncf %16 : vector<128x32xf32> to vector<128x32xbf16>
    %c32 = arith.constant 32 : index
    %c0_23 = arith.constant 0 : index
    %18 = vector.load %arg5[%c32, %c0_23] : memref<288x64xbf16, #tpu.memory_space<vmem>>, vector<32x64xbf16>
    %cst_24 = arith.constant dense<0.000000e+00> : vector<128x64xf32>
    %19 = tpu.matmul %17, %18, %cst_24 {dimension_numbers = #tpu.dot_dimension_numbers<[1], [0], [0], [1], [0, 0, 1, 1], [], []>} : vector<128x32xbf16>, vector<32x64xbf16>, vector<128x64xf32> -> vector<128x64xf32>
    %20 = arith.addf %14, %19 : vector<128x64xf32>
    %c0_25 = arith.constant 0 : index
    %c0_26 = arith.constant 0 : index
    %c4 = arith.constant 4 : index
    %c0_27 = arith.constant 0 : index
    %21 = vector.load %arg6[%c0_25, %c0_26, %c4, %c0_27] : memref<2x12x12x32xf32, #tpu.memory_space<vmem>>, vector<2x8x8x32xf32>
    %22 = vector.shape_cast %21 : vector<2x8x8x32xf32> to vector<128x32xf32>
    %23 = arith.truncf %22 : vector<128x32xf32> to vector<128x32xbf16>
    %c64 = arith.constant 64 : index
    %c0_28 = arith.constant 0 : index
    %24 = vector.load %arg5[%c64, %c0_28] : memref<288x64xbf16, #tpu.memory_space<vmem>>, vector<32x64xbf16>
    %cst_29 = arith.constant dense<0.000000e+00> : vector<128x64xf32>
    %25 = tpu.matmul %23, %24, %cst_29 {dimension_numbers = #tpu.dot_dimension_numbers<[1], [0], [0], [1], [0, 0, 1, 1], [], []>} : vector<128x32xbf16>, vector<32x64xbf16>, vector<128x64xf32> -> vector<128x64xf32>
    %26 = arith.addf %20, %25 : vector<128x64xf32>
    %c0_30 = arith.constant 0 : index
    %c2_31 = arith.constant 2 : index
    %c0_32 = arith.constant 0 : index
    %c0_33 = arith.constant 0 : index
    %27 = vector.load %arg6[%c0_30, %c2_31, %c0_32, %c0_33] : memref<2x12x12x32xf32, #tpu.memory_space<vmem>>, vector<2x8x8x32xf32>
    %28 = vector.shape_cast %27 : vector<2x8x8x32xf32> to vector<128x32xf32>
    %29 = arith.truncf %28 : vector<128x32xf32> to vector<128x32xbf16>
    %c96 = arith.constant 96 : index
    %c0_34 = arith.constant 0 : index
    %30 = vector.load %arg5[%c96, %c0_34] : memref<288x64xbf16, #tpu.memory_space<vmem>>, vector<32x64xbf16>
    %cst_35 = arith.constant dense<0.000000e+00> : vector<128x64xf32>
    %31 = tpu.matmul %29, %30, %cst_35 {dimension_numbers = #tpu.dot_dimension_numbers<[1], [0], [0], [1], [0, 0, 1, 1], [], []>} : vector<128x32xbf16>, vector<32x64xbf16>, vector<128x64xf32> -> vector<128x64xf32>
    %32 = arith.addf %26, %31 : vector<128x64xf32>
    %c0_36 = arith.constant 0 : index
    %c2_37 = arith.constant 2 : index
    %c2_38 = arith.constant 2 : index
    %c0_39 = arith.constant 0 : index
    %33 = vector.load %arg6[%c0_36, %c2_37, %c2_38, %c0_39] : memref<2x12x12x32xf32, #tpu.memory_space<vmem>>, vector<2x8x8x32xf32>
    %34 = vector.shape_cast %33 : vector<2x8x8x32xf32> to vector<128x32xf32>
    %35 = arith.truncf %34 : vector<128x32xf32> to vector<128x32xbf16>
    %c128 = arith.constant 128 : index
    %c0_40 = arith.constant 0 : index
    %36 = vector.load %arg5[%c128, %c0_40] : memref<288x64xbf16, #tpu.memory_space<vmem>>, vector<32x64xbf16>
    %cst_41 = arith.constant dense<0.000000e+00> : vector<128x64xf32>
    %37 = tpu.matmul %35, %36, %cst_41 {dimension_numbers = #tpu.dot_dimension_numbers<[1], [0], [0], [1], [0, 0, 1, 1], [], []>} : vector<128x32xbf16>, vector<32x64xbf16>, vector<128x64xf32> -> vector<128x64xf32>
    %38 = arith.addf %32, %37 : vector<128x64xf32>
    %c0_42 = arith.constant 0 : index
    %c2_43 = arith.constant 2 : index
    %c4_44 = arith.constant 4 : index
    %c0_45 = arith.constant 0 : index
    %39 = vector.load %arg6[%c0_42, %c2_43, %c4_44, %c0_45] : memref<2x12x12x32xf32, #tpu.memory_space<vmem>>, vector<2x8x8x32xf32>
    %40 = vector.shape_cast %39 : vector<2x8x8x32xf32> to vector<128x32xf32>
    %41 = arith.truncf %40 : vector<128x32xf32> to vector<128x32xbf16>
    %c160 = arith.constant 160 : index
    %c0_46 = arith.constant 0 : index
    %42 = vector.load %arg5[%c160, %c0_46] : memref<288x64xbf16, #tpu.memory_space<vmem>>, vector<32x64xbf16>
    %cst_47 = arith.constant dense<0.000000e+00> : vector<128x64xf32>
    %43 = tpu.matmul %41, %42, %cst_47 {dimension_numbers = #tpu.dot_dimension_numbers<[1], [0], [0], [1], [0, 0, 1, 1], [], []>} : vector<128x32xbf16>, vector<32x64xbf16>, vector<128x64xf32> -> vector<128x64xf32>
    %44 = arith.addf %38, %43 : vector<128x64xf32>
    %c0_48 = arith.constant 0 : index
    %c4_49 = arith.constant 4 : index
    %c0_50 = arith.constant 0 : index
    %c0_51 = arith.constant 0 : index
    %45 = vector.load %arg6[%c0_48, %c4_49, %c0_50, %c0_51] : memref<2x12x12x32xf32, #tpu.memory_space<vmem>>, vector<2x8x8x32xf32>
    %46 = vector.shape_cast %45 : vector<2x8x8x32xf32> to vector<128x32xf32>
    %47 = arith.truncf %46 : vector<128x32xf32> to vector<128x32xbf16>
    %c192 = arith.constant 192 : index
    %c0_52 = arith.constant 0 : index
    %48 = vector.load %arg5[%c192, %c0_52] : memref<288x64xbf16, #tpu.memory_space<vmem>>, vector<32x64xbf16>
    %cst_53 = arith.constant dense<0.000000e+00> : vector<128x64xf32>
    %49 = tpu.matmul %47, %48, %cst_53 {dimension_numbers = #tpu.dot_dimension_numbers<[1], [0], [0], [1], [0, 0, 1, 1], [], []>} : vector<128x32xbf16>, vector<32x64xbf16>, vector<128x64xf32> -> vector<128x64xf32>
    %50 = arith.addf %44, %49 : vector<128x64xf32>
    %c0_54 = arith.constant 0 : index
    %c4_55 = arith.constant 4 : index
    %c2_56 = arith.constant 2 : index
    %c0_57 = arith.constant 0 : index
    %51 = vector.load %arg6[%c0_54, %c4_55, %c2_56, %c0_57] : memref<2x12x12x32xf32, #tpu.memory_space<vmem>>, vector<2x8x8x32xf32>
    %52 = vector.shape_cast %51 : vector<2x8x8x32xf32> to vector<128x32xf32>
    %53 = arith.truncf %52 : vector<128x32xf32> to vector<128x32xbf16>
    %c224 = arith.constant 224 : index
    %c0_58 = arith.constant 0 : index
    %54 = vector.load %arg5[%c224, %c0_58] : memref<288x64xbf16, #tpu.memory_space<vmem>>, vector<32x64xbf16>
    %cst_59 = arith.constant dense<0.000000e+00> : vector<128x64xf32>
    %55 = tpu.matmul %53, %54, %cst_59 {dimension_numbers = #tpu.dot_dimension_numbers<[1], [0], [0], [1], [0, 0, 1, 1], [], []>} : vector<128x32xbf16>, vector<32x64xbf16>, vector<128x64xf32> -> vector<128x64xf32>
    %56 = arith.addf %50, %55 : vector<128x64xf32>
    %c0_60 = arith.constant 0 : index
    %c4_61 = arith.constant 4 : index
    %c4_62 = arith.constant 4 : index
    %c0_63 = arith.constant 0 : index
    %57 = vector.load %arg6[%c0_60, %c4_61, %c4_62, %c0_63] : memref<2x12x12x32xf32, #tpu.memory_space<vmem>>, vector<2x8x8x32xf32>
    %58 = vector.shape_cast %57 : vector<2x8x8x32xf32> to vector<128x32xf32>
    %59 = arith.truncf %58 : vector<128x32xf32> to vector<128x32xbf16>
    %c256 = arith.constant 256 : index
    %c0_64 = arith.constant 0 : index
    %60 = vector.load %arg5[%c256, %c0_64] : memref<288x64xbf16, #tpu.memory_space<vmem>>, vector<32x64xbf16>
    %cst_65 = arith.constant dense<0.000000e+00> : vector<128x64xf32>
    %61 = tpu.matmul %59, %60, %cst_65 {dimension_numbers = #tpu.dot_dimension_numbers<[1], [0], [0], [1], [0, 0, 1, 1], [], []>} : vector<128x32xbf16>, vector<32x64xbf16>, vector<128x64xf32> -> vector<128x64xf32>
    %62 = arith.addf %56, %61 : vector<128x64xf32>
    %c0_66 = arith.constant 0 : index
    %c0_67 = arith.constant 0 : index
    %63 = vector.load %arg3[%c0_66, %c0_67] : memref<1x64xf32, #tpu.memory_space<vmem>>, vector<1x64xf32>
    %64 = vector.broadcast %63 : vector<1x64xf32> to vector<128x64xf32>
    %65 = arith.addf %62, %64 : vector<128x64xf32>
    %cst_68 = arith.constant 0.000000e+00 : f32
    %66 = vector.broadcast %cst_68 : f32 to vector<128x64xf32>
    %67 = arith.maximumf %65, %66 : vector<128x64xf32>
    %68 = vector.shape_cast %67 : vector<128x64xf32> to vector<2x8x8x64xf32>
    %c0_69 = arith.constant 0 : index
    %c0_70 = arith.constant 0 : index
    %c0_71 = arith.constant 0 : index
    %c0_72 = arith.constant 0 : index
    %69 = vector.load %arg4[%c0_69, %c0_70, %c0_71, %c0_72] : memref<2x8x8x64xf32, #tpu.memory_space<vmem>>, vector<2x8x8x64xf32>
    tpu.vector_store %arg4[%c0_69, %c0_70, %c0_71, %c0_72], %68 {strides = array<i32>} : memref<2x8x8x64xf32, #tpu.memory_space<vmem>>, vector<2x8x8x64xf32>,
    return
  }
  func.func @transform_0(%arg0: i32) -> (i32, i32, i32, i32) {
    %c0_i32 = arith.constant 0 : i32
    %c0_i32_0 = arith.constant 0 : i32
    %c0_i32_1 = arith.constant 0 : i32
    %c0_i32_2 = arith.constant 0 : i32
    %c0_i32_3 = arith.constant 0 : i32
    return %c0_i32, %c0_i32_0, %c0_i32_1, %c0_i32_2 : i32, i32, i32, i32
  }
  func.func @transform_2(%arg0: i32) -> (i32, i32) {
    %c0_i32 = arith.constant 0 : i32
    %c0_i32_0 = arith.constant 0 : i32
    %c0_i32_1 = arith.constant 0 : i32
    return %c0_i32, %c0_i32_0 : i32, i32
  }
  func.func @transform_3(%arg0: i32) -> (i32, i32, i32, i32) {
    %c0_i32 = arith.constant 0 : i32
    %c0_i32_0 = arith.constant 0 : i32
    %c0_i32_1 = arith.constant 0 : i32
    %c0_i32_2 = arith.constant 0 : i32
    %c0_i32_3 = arith.constant 0 : i32
    return %c0_i32, %c0_i32_0, %c0_i32_1, %c0_i32_2 : i32, i32, i32, i32
  }
}

</mosaic_0001>

<bundles_post_ra>
// kernel: tpu_custom_call.1
= control target key start
LH: loop header
LB: loop body
LE: loop exit
PB: predicated region body
PF: predicated region fallthrough
CT: control target
= control target key end

     0   :  { %8 = vsyncpa [#allocation6], 0  ;;  %vm90_vm0 = vcmask 261120   ;;  %vm92_vm1 = vcmask 257024   ;;  %s2688_s0 = inlined_call_operand.vmem [shape: f32[2,8,8,32], index: 0, kind: input, shape index: {}]   ;;  %s2689_s1 = inlined_call_operand.vmem [shape: bf16[288,64], index: 1, kind: input, shape index: {}]   ;;  %s2690_s2 = inlined_call_operand.vmem [shape: f32[1,64], index: 2, kind: input, shape index: {}]   ;;  %s2691_s3 = inlined_call_operand.hbm [shape: f32[2,8,8,64], index: 3, kind: output, shape index: {}]  }
   0x1   :  { %v2232_v0 = vld [vmem:[%s2689_s1] sm:$0xff]  ;;  %v2237_v1 = vld [vmem:[%s2689_s1 + $0x8] sm:$0xff]  ;;  %v2242_v2 = vld [vmem:[%s2689_s1 + $0x10] sm:$0xff] }
   0x2   :  { %v2247_v3 = vld [vmem:[%s2689_s1 + $0x18] sm:$0xff]  ;;  %v2252_v4 = vld [vmem:[%s2689_s1 + $0x20] sm:$0xff]  ;;  %v2257_v5 = vld [vmem:[%s2689_s1 + $0x28] sm:$0xff] }
   0x3   :  { %v2262_v6 = vld [vmem:[%s2689_s1 + $0x30] sm:$0xff]  ;;  %v2267_v7 = vld [vmem:[%s2689_s1 + $0x38] sm:$0xff]  ;;  %v2272_v8 = vld [vmem:[%s2689_s1 + $0x40] sm:$0xff] }
   0x4   :  { %v2277_v9 = vld [vmem:[%s2689_s1 + $0x48] sm:$0xff]  ;;  %v2282_v10 = vld [vmem:[%s2689_s1 + $0x50] sm:$0xff]  ;;  %v2287_v11 = vld [vmem:[%s2689_s1 + $0x58] sm:$0xff] }
   0x5   :  { %v2292_v12 = vld [vmem:[%s2689_s1 + $0x60] sm:$0xff]  ;;  %v2297_v13 = vld [vmem:[%s2689_s1 + $0x68] sm:$0xff]  ;;  %v2302_v14 = vld [vmem:[%s2689_s1 + $0x70] sm:$0xff] }
   0x6   :  { %v2307_v15 = vld [vmem:[%s2689_s1 + $0x78] sm:$0xff]  ;;  %v2312_v16 = vld [vmem:[%s2689_s1 + $0x80] sm:$0xff]  ;;  %v2317_v17 = vld [vmem:[%s2689_s1 + $0x88] sm:$0xff] }
   0x7   :  { %89 = vsyncadd [#allocation4], 2304  ;;  %v140_v18 = vld [vmem:[%s2688_s0] sm:$0xff]  ;;  %v2205_v19 = vmov 0.0   ;;  %v141_v20 = vld [vmem:[%s2688_s0 + $0x8] sm:$0xff] }
   0x8   :  { %96 = vst.msk [vmem:[#allocation3 + $0x20] sm:$0xff] %vm90_vm0, %v2205_v19  ;;  %91 = vst.msk [vmem:[#allocation3] sm:$0xff] %vm90_vm0, %v2205_v19  ;;  %v142_v21 = vld [vmem:[%s2688_s0 + $0x10] sm:$0xff]  ;;  %v143_v22 = vld [vmem:[%s2688_s0 + $0x18] sm:$0xff] }
   0x9   :  { %94 = vst.msk [vmem:[#allocation3 + $0x10] sm:$0xff] %vm90_vm0, %v2205_v19  ;;  %98 = vst.msk [vmem:[#allocation3 + $0x30] sm:$0xff] %vm90_vm0, %v2205_v19  ;;  %v144_v23 = vld [vmem:[%s2688_s0 + $0x20] sm:$0xff]  ;;  %v145_v24 = vld [vmem:[%s2688_s0 + $0x28] sm:$0xff] }
   0xa   :  { %100 = vst.msk [vmem:[#allocation3 + $0x40] sm:$0xff] %vm90_vm0, %v2205_v19  ;;  %102 = vst.msk [vmem:[#allocation3 + $0x50] sm:$0xff] %vm90_vm0, %v2205_v19  ;;  %v146_v25 = vld [vmem:[%s2688_s0 + $0x30] sm:$0xff]  ;;  %v147_v26 = vld [vmem:[%s2688_s0 + $0x38] sm:$0xff] }
   0xb   :  { %104 = vst.msk [vmem:[#allocation3 + $0x60] sm:$0xff] %vm90_vm0, %v2205_v19  ;;  %106 = vst.msk [vmem:[#allocation3 + $0x70] sm:$0xff] %vm90_vm0, %v2205_v19  ;;  %v148_v27 = vld [vmem:[%s2688_s0 + $0x40] sm:$0xff]  ;;  %v149_v28 = vld [vmem:[%s2688_s0 + $0x48] sm:$0xff] }
   0xc   :  { %108 = vst.msk [vmem:[#allocation3 + $0x80] sm:$0xff] %vm90_vm0, %v2205_v19  ;;  %110 = vst.msk [vmem:[#allocation3 + $0x90] sm:$0xff] %vm90_vm0, %v2205_v19  ;;  %v150_v29 = vld [vmem:[%s2688_s0 + $0x50] sm:$0xff]  ;;  %v151_v30 = vld [vmem:[%s2688_s0 + $0x58] sm:$0xff] }
   0xd   :  { %112 = vst.msk [vmem:[#allocation3 + $0xa0] sm:$0xff] %vm90_vm0, %v2205_v19  ;;  %114 = vst.msk [vmem:[#allocation3 + $0xb0] sm:$0xff] %vm90_vm0, %v2205_v19  ;;  %v152_v31 = vld [vmem:[%s2688_s0 + $0x60] sm:$0xff]  ;;  %v153_v32 = vld [vmem:[%s2688_s0 + $0x68] sm:$0xff] }
   0xe   :  { %116 = vst.msk [vmem:[#allocation3 + $0xc0] sm:$0xff] %vm90_vm0, %v2205_v19  ;;  %118 = vst.msk [vmem:[#allocation3 + $0xd0] sm:$0xff] %vm90_vm0, %v2205_v19  ;;  %v154_v33 = vld [vmem:[%s2688_s0 + $0x70] sm:$0xff]  ;;  %v155_v34 = vld [vmem:[%s2688_s0 + $0x78] sm:$0xff] }
   0xf   :  { %120 = vst.msk [vmem:[#allocation3 + $0xe0] sm:$0xff] %vm90_vm0, %v2205_v19  ;;  %122 = vst.msk [vmem:[#allocation3 + $0xf0] sm:$0xff] %vm90_vm0, %v2205_v19 }
  0x10   :  { %124 = vst.msk [vmem:[#allocation3 + $0x100] sm:$0xff] %vm90_vm0, %v2205_v19  ;;  %126 = vst.msk [vmem:[#allocation3 + $0x110] sm:$0xff] %vm90_vm0, %v2205_v19 }
  0x11   :  { %128 = vst.msk [vmem:[#allocation3 + $0x120] sm:$0xff] %vm90_vm0, %v2205_v19  ;;  %130 = vst.msk [vmem:[#allocation3 + $0x130] sm:$0xff] %vm90_vm0, %v2205_v19 }
  0x12   :  { %132 = vst.msk [vmem:[#allocation3 + $0x140] sm:$0xff] %vm90_vm0, %v2205_v19  ;;  %134 = vst.msk [vmem:[#allocation3 + $0x150] sm:$0xff] %vm90_vm0, %v2205_v19 }
  0x13   :  { %136 = vst.msk [vmem:[#allocation3 + $0x160] sm:$0xff] %vm90_vm0, %v2205_v19  ;;  %138 = vst.msk [vmem:[#allocation3 + $0x170] sm:$0xff] %vm90_vm0, %v2205_v19 }
  0x14   :  { %97 = vst.msk [vmem:[#allocation3 + $0x28] sm:$0xf] %vm92_vm1, %v2205_v19  ;;  %93 = vst.msk [vmem:[#allocation3 + $0x8] sm:$0xf] %vm92_vm1, %v2205_v19 }
  0x15   :  { %95 = vst.msk [vmem:[#allocation3 + $0x18] sm:$0xf] %vm92_vm1, %v2205_v19  ;;  %99 = vst.msk [vmem:[#allocation3 + $0x38] sm:$0xf] %vm92_vm1, %v2205_v19 }
  0x16   :  { %101 = vst.msk [vmem:[#allocation3 + $0x48] sm:$0xf] %vm92_vm1, %v2205_v19  ;;  %103 = vst.msk [vmem:[#allocation3 + $0x58] sm:$0xf] %vm92_vm1, %v2205_v19 }
  0x17   :  { %105 = vst.msk [vmem:[#allocation3 + $0x68] sm:$0xf] %vm92_vm1, %v2205_v19  ;;  %107 = vst.msk [vmem:[#allocation3 + $0x78] sm:$0xf] %vm92_vm1, %v2205_v19 }
  0x18   :  { %109 = vst.msk [vmem:[#allocation3 + $0x88] sm:$0xf] %vm92_vm1, %v2205_v19  ;;  %111 = vst.msk [vmem:[#allocation3 + $0x98] sm:$0xf] %vm92_vm1, %v2205_v19 }
  0x19   :  { %113 = vst.msk [vmem:[#allocation3 + $0xa8] sm:$0xf] %vm92_vm1, %v2205_v19  ;;  %115 = vst.msk [vmem:[#allocation3 + $0xb8] sm:$0xf] %vm92_vm1, %v2205_v19 }
  0x1a   :  { %117 = vst.msk [vmem:[#allocation3 + $0xc8] sm:$0xf] %vm92_vm1, %v2205_v19  ;;  %119 = vst.msk [vmem:[#allocation3 + $0xd8] sm:$0xf] %vm92_vm1, %v2205_v19 }
  0x1b   :  { %121 = vst.msk [vmem:[#allocation3 + $0xe8] sm:$0xf] %vm92_vm1, %v2205_v19  ;;  %123 = vst.msk [vmem:[#allocation3 + $0xf8] sm:$0xf] %vm92_vm1, %v2205_v19 }
  0x1c   :  { %125 = vst.msk [vmem:[#allocation3 + $0x108] sm:$0xf] %vm92_vm1, %v2205_v19  ;;  %127 = vst.msk [vmem:[#allocation3 + $0x118] sm:$0xf] %vm92_vm1, %v2205_v19 }
  0x1d   :  { %129 = vst.msk [vmem:[#allocation3 + $0x128] sm:$0xf] %vm92_vm1, %v2205_v19  ;;  %131 = vst.msk [vmem:[#allocation3 + $0x138] sm:$0xf] %vm92_vm1, %v2205_v19 }
  0x1e   :  { %133 = vst.msk [vmem:[#allocation3 + $0x148] sm:$0xf] %vm92_vm1, %v2205_v19  ;;  %135 = vst.msk [vmem:[#allocation3 + $0x158] sm:$0xf] %vm92_vm1, %v2205_v19 }
  0x1f   :  { %137 = vst.msk [vmem:[#allocation3 + $0x168] sm:$0xf] %vm92_vm1, %v2205_v19  ;;  %139 = vst.msk [vmem:[#allocation3 + $0x178] sm:$0xf] %vm92_vm1, %v2205_v19 }
  0x20   :  { %157 = vst.msk [vmem:[#allocation3 + $0x22] sm:$0xff] %vm90_vm0, %v140_v18  ;;  %158 = vst.msk [vmem:[#allocation3 + $0x32] sm:$0xff] %vm90_vm0, %v141_v20 }
  0x21   :  { %159 = vst.msk [vmem:[#allocation3 + $0x42] sm:$0xff] %vm90_vm0, %v142_v21  ;;  %160 = vst.msk [vmem:[#allocation3 + $0x52] sm:$0xff] %vm90_vm0, %v143_v22 }
  0x22   :  { %161 = vst.msk [vmem:[#allocation3 + $0x62] sm:$0xff] %vm90_vm0, %v144_v23  ;;  %162 = vst.msk [vmem:[#allocation3 + $0x72] sm:$0xff] %vm90_vm0, %v145_v24 }
  0x23   :  { %163 = vst.msk [vmem:[#allocation3 + $0x82] sm:$0xff] %vm90_vm0, %v146_v25  ;;  %164 = vst.msk [vmem:[#allocation3 + $0x92] sm:$0xff] %vm90_vm0, %v147_v26 }
  0x24   :  { %165 = vst.msk [vmem:[#allocation3 + $0xe2] sm:$0xff] %vm90_vm0, %v148_v27  ;;  %166 = vst.msk [vmem:[#allocation3 + $0xf2] sm:$0xff] %vm90_vm0, %v149_v28 }
  0x25   :  { %167 = vst.msk [vmem:[#allocation3 + $0x102] sm:$0xff] %vm90_vm0, %v150_v29  ;;  %168 = vst.msk [vmem:[#allocation3 + $0x112] sm:$0xff] %vm90_vm0, %v151_v30 }
  0x26   :  { %169 = vst.msk [vmem:[#allocation3 + $0x122] sm:$0xff] %vm90_vm0, %v152_v31  ;;  %170 = vst.msk [vmem:[#allocation3 + $0x132] sm:$0xff] %vm90_vm0, %v153_v32 }
  0x27   :  { %171 = vst.msk [vmem:[#allocation3 + $0x142] sm:$0xff] %vm90_vm0, %v154_v33  ;;  %172 = vst.msk [vmem:[#allocation3 + $0x152] sm:$0xff] %vm90_vm0, %v155_v34 }
  0x28   :  { %2201 = dma.done.wait [#allocation4], 2304 }
  0x29   :  { %2202 = vsyncadd [#allocation4], 4294964992  ;;  %1863 = vmatprep.subr.bf16.mxu1 %v2242_v2  ;;  %1943 = vmatprep.subr.bf16.mxu0 %v2272_v8  ;;  %v203_v35 = vld [vmem:[#allocation3 + $0x2] sm:$0xff]  ;;  %v204_v36 = vld [vmem:[#allocation3 + $0x12] sm:$0xff]  ;;  %vm1652_vm2 = vcmask 523264  }
  0x2a   :  { %1864 = vmatpush3.bf16.msra.mxu1 %v2242_v2  ;;  %1944 = vmatpush3.bf16.msra.mxu0 %v2272_v8  ;;  %v797_v37 = vld [vmem:[#allocation3 + $0x22] sm:$0xff]  ;;  %v219_v38 = vpack.c.bf16 %v204_v36, %v203_v35  ;;  %v798_v39 = vld [vmem:[#allocation3 + $0x32] sm:$0xff] }
  0x2b   :  { %1865 = vmatprep.subr.bf16.mxu1 %v2247_v3  ;;  %1945 = vmatprep.subr.bf16.mxu0 %v2277_v9  ;;  %v799_v40 = vld [vmem:[#allocation3 + $0x42] sm:$0xff]  ;;  %v800_v41 = vld [vmem:[#allocation3 + $0x52] sm:$0xff]  ;;  %v813_v42 = vpack.c.bf16 %v798_v39, %v797_v37 }
  0x2c   :  { %v2441_v43 = vpack.c.bf16 %v800_v41, %v799_v40  ;;  %v801_v44 = vld [vmem:[#allocation3 + $0x62] sm:$0xff]  ;;  %v802_v45 = vld [vmem:[#allocation3 + $0x72] sm:$0xff]  ;;  %1867 = vmatprep.mubr.msk.bf16.mxu1 %vm90_vm0, %v219_v38 }
  0x2d   :  { %v2444_v46 = vpack.c.bf16 %v802_v45, %v801_v44  ;;  %1947 = vmatprep.mubr.msk.bf16.mxu0 %vm90_vm0, %v813_v42  ;;  %v803_v47 = vld [vmem:[#allocation3 + $0x82] sm:$0xff]  ;;  %v804_v48 = vld [vmem:[#allocation3 + $0x92] sm:$0xff] }
  0x2e   :  { %1866 = vmatpush3.bf16.msra.mxu1 %v2247_v3  ;;  %1946 = vmatpush3.bf16.msra.mxu0 %v2277_v9  ;;  %v211_v49 = vld [vmem:[#allocation3 + $0xc2] sm:$0xff]  ;;  %v212_v50 = vld [vmem:[#allocation3 + $0xd2] sm:$0xff]  ;;  %v2458_v53 = vpack.c.bf16 %v804_v48, %v803_v47 }
  0x2f   :  { %1883 = vmatprep.subr.bf16.mxu1 %v2232_v0  ;;  %1963 = vmatprep.subr.bf16.mxu0 %v2282_v10  ;;  %v960_v51 = vld [vmem:[#allocation3 + $0x24] sm:$0xff]  ;;  %v961_v52 = vld [vmem:[#allocation3 + $0x34] sm:$0xff]  ;;  %v223_v54 = vpack.c.bf16 %v212_v50, %v211_v49 }
  0x30   :  { %v2462_v55 = vpack.c.bf16 %v961_v52, %v960_v51  ;;  %v213_v56 = vld [vmem:[#allocation3 + $0xe2] sm:$0xff]  ;;  %v214_v57 = vld [vmem:[#allocation3 + $0xf2] sm:$0xff] }
  0x31   :  { %1868 = vmatmul.mubr.msk.bf16.vlgmr.msra.gmra.mrb[0].mxu1 %vm90_vm0, %v813_v42  ;;  %1948 = vmatmul.mubr.msk.bf16.vlgmr.msra.gmra.mrb[0].mxu0 %vm90_vm0, %v2441_v43  ;;  %v962_v58 = vld [vmem:[#allocation3 + $0x44] sm:$0xff]  ;;  %v963_v59 = vld [vmem:[#allocation3 + $0x54] sm:$0xff] }
  0x32   :  { %1884 = vmatpush3.bf16.msra.mxu1 %v2232_v0  ;;  %1964 = vmatpush3.bf16.msra.mxu0 %v2282_v10  ;;  %v215_v60 = vld [vmem:[#allocation3 + $0x102] sm:$0xff]  ;;  %v216_v61 = vld [vmem:[#allocation3 + $0x112] sm:$0xff]  ;;  %v2473_v0 = vpack.c.bf16 %v214_v57, %v213_v56 }
  0x33   :  { %1871 = vmatprep.mubr.msk.bf16.mxu1 %vm90_vm0, %v2441_v43  ;;  %1951 = vmatprep.mubr.msk.bf16.mxu0 %vm90_vm0, %v2444_v46  ;;  %v964_v62 = vld [vmem:[#allocation3 + $0x64] sm:$0xff]  ;;  %v965_v63 = vld [vmem:[#allocation3 + $0x74] sm:$0xff]  ;;  %v2477_v2 = vpack.c.bf16 %v216_v61, %v215_v60 }
  0x34   :  { %1965 = vmatprep.subr.bf16.mxu0 %v2287_v11  ;;  %1885 = vmatprep.subr.bf16.mxu1 %v2237_v1  ;;  %v2479_v3 = vpack.c.bf16 %v965_v63, %v964_v62  ;;  %v217_v10 = vld [vmem:[#allocation3 + $0x122] sm:$0xff]  ;;  %v967_v19 = vld [vmem:[#allocation3 + $0x94] sm:$0xff] }
  0x35   :  { %v966_v18 = vld [vmem:[#allocation3 + $0x84] sm:$0xff]  ;;  %v178_v21 = vld [vmem:[#allocation3 + $0x10] sm:$0xff] }
  0x36   :  { %1886 = vmatpush3.bf16.msra.mxu1 %v2237_v1  ;;  %1966 = vmatpush3.bf16.msra.mxu0 %v2287_v11  ;;  %v2475_v1 = vpack.c.bf16 %v963_v59, %v962_v58  ;;  %v218_v11 = vld [vmem:[#allocation3 + $0x132] sm:$0xff]  ;;  %v177_v20 = vld [vmem:[#allocation3] sm:$0xff]  ;;  %v2493_v25 = vpack.c.bf16 %v967_v19, %v966_v18 }
  0x37   :  { %1903 = vmatprep.subr.bf16.mxu1 %v2252_v4  ;;  %1983 = vmatprep.subr.bf16.mxu0 %v2292_v12  ;;  %v968_v22 = vld [vmem:[#allocation3 + $0xe4] sm:$0xff]  ;;  %v969_v23 = vld [vmem:[#allocation3 + $0xf4] sm:$0xff]  ;;  %v2491_v24 = vpack.c.bf16 %v218_v11, %v217_v10  ;;  %v193_v26 = vpack.c.bf16 %v178_v21, %v177_v20 }
  0x38   :  { %v2495_v27 = vpack.c.bf16 %v969_v23, %v968_v22  ;;  %v180_v28 = vld [vmem:[#allocation3 + $0x30] sm:$0xff]  ;;  %v970_v29 = vld [vmem:[#allocation3 + $0x104] sm:$0xff] }
  0x39   :  { %1872 = vmatmul.mubr.msk.bf16.gmra.mrb[4].mxu1 %vm90_vm0, %v2444_v46  ;;  %1952 = vmatmul.mubr.msk.bf16.gmra.mrb[4].mxu0 %vm90_vm0, %v2458_v53  ;;  %v971_v30 = vld [vmem:[#allocation3 + $0x114] sm:$0xff]  ;;  %v181_v31 = vld [vmem:[#allocation3 + $0x40] sm:$0xff] }
  0x3a   :  { %1875 = vmatprep.mubr.msk.bf16.mxu1 %vm90_vm0, %v223_v54  ;;  %1967 = vmatprep.mubr.msk.bf16.mxu0 %vm90_vm0, %v2462_v55  ;;  %v182_v32 = vld [vmem:[#allocation3 + $0x50] sm:$0xff]  ;;  %v2508_v35 = vpack.c.bf16 %v971_v30, %v970_v29  ;;  %v183_v38 = vld [vmem:[#allocation3 + $0x60] sm:$0xff] }
  0x3b   :  { %v973_v33 = vld [vmem:[#allocation3 + $0x134] sm:$0xff]  ;;  %v2510_v36 = vpack.c.bf16 %v182_v32, %v181_v31  ;;  %v974_v40 = vld [vmem:[#allocation3 + $0x144] sm:$0xff] }
  0x3c   :  { %v184_v39 = vld [vmem:[#allocation3 + $0x70] sm:$0xff]  ;;  %v185_v42 = vld [vmem:[#allocation3 + $0xc0] sm:$0xff] }
  0x3d   :  { %v975_v41 = vld [vmem:[#allocation3 + $0x154] sm:$0xff]  ;;  %v2524_v45 = vpack.c.bf16 %v184_v39, %v183_v38  ;;  %v187_v48 = vld [vmem:[#allocation3 + $0xe0] sm:$0xff] }
  0x3e   :  { %v186_v44 = vld [vmem:[#allocation3 + $0xd0] sm:$0xff]  ;;  %v189_v50 = vld [vmem:[#allocation3 + $0x100] sm:$0xff] }
  0x3f   :  { %v197_v47 = vpack.c.bf16 %v186_v44, %v185_v42  ;;  %v188_v49 = vld [vmem:[#allocation3 + $0xf0] sm:$0xff]  ;;  %v1128_v52 = vld [vmem:[#allocation3 + $0x80] sm:$0xff] }
  0x40   :  { %v190_v51 = vld [vmem:[#allocation3 + $0x110] sm:$0xff]  ;;  %v191_v58 = vld [vmem:[#allocation3 + $0x120] sm:$0xff] }
  0x41   :  { %1876 = vmatmul.mubr.msk.bf16.gmra.mrb[8].mxu1 %vm90_vm0, %v2473_v0  ;;  %1968 = vmatmul.mubr.msk.bf16.vlgmr.msra.gmra.mrb[0].mxu0 %vm90_vm0, %v2475_v1  ;;  %v1129_v54 = vld [vmem:[#allocation3 + $0x90] sm:$0xff]  ;;  %v2539_v56 = vpack.c.bf16 %v190_v51, %v189_v50  ;;  %v1130_v60 = vld [vmem:[#allocation3 + $0xa0] sm:$0xff] }
  0x42   :  { %1879 = vmatprep.mubr.msk.bf16.mxu1 %vm90_vm0, %v2477_v2  ;;  %1984 = vmatpush3.bf16.msra.mxu0 %v2292_v12  ;;  %v179_v12 = vld [vmem:[#allocation3 + $0x20] sm:$0xff]  ;;  %v2541_v57 = vpack.c.bf16 %v1129_v54, %v1128_v52  ;;  %v192_v59 = vld [vmem:[#allocation3 + $0x130] sm:$0xff] }
  0x43   :  { %1971 = vmatprep.mubr.msk.bf16.mxu0 %vm90_vm0, %v2479_v3  ;;  %1985 = vmatprep.subr.bf16.mxu0 %v2297_v13  ;;  %v2506_v34 = vpack.c.bf16 %v180_v28, %v179_v12  ;;  %v1131_v61 = vld [vmem:[#allocation3 + $0xb0] sm:$0xff]  ;;  %v471_v62 = vld [vmem:[#allocation3 + $0x4] sm:$0xff]  ;;  %v2553_v10 = vpack.c.bf16 %v192_v59, %v191_v58 }
  0x44   :  { %v472_v63 = vld [vmem:[#allocation3 + $0x14] sm:$0xff]  ;;  %v1143_v11 = vpack.c.bf16 %v1131_v61, %v1130_v60  ;;  %v479_v22 = vld [vmem:[#allocation3 + $0xc4] sm:$0xff] }
  0x45   :  { %v487_v18 = vpack.c.bf16 %v472_v63, %v471_v62  ;;  %v1137_v19 = vld [vmem:[#allocation3 + $0x150] sm:$0xff] }
  0x46   :  { %1986 = vmatpush3.bf16.msra.mxu0 %v2297_v13  ;;  %v972_v13 = vld [vmem:[#allocation3 + $0x124] sm:$0xff]  ;;  %v1139_v21 = vld [vmem:[#allocation3 + $0x170] sm:$0xff] }
  0x47   :  { %2003 = vmatprep.subr.bf16.mxu0 %v2302_v14  ;;  %v2512_v37 = vpack.c.bf16 %v973_v33, %v972_v13  ;;  %v480_v23 = vld [vmem:[#allocation3 + $0xd4] sm:$0xff] }
  0x48   :  { %v491_v12 = vpack.c.bf16 %v480_v23, %v479_v22 }
  0x49   :  { %1880 = vmatmul.mubr.msk.bf16.gmra.mrb[12].mxu1 %vm90_vm0, %v2491_v24  ;;  %1972 = vmatmul.mubr.msk.bf16.gmra.mrb[4].mxu0 %vm90_vm0, %v2493_v25 }
  0x4a   :  { %1887 = vmatprep.mubr.msk.bf16.mxu1 %vm90_vm0, %v193_v26  ;;  %1975 = vmatprep.mubr.msk.bf16.mxu0 %vm90_vm0, %v2495_v27 }
  0x51   :  { %1888 = vmatmul.mubr.msk.bf16.vlgmr.msra.gmra.mrb[0].mxu1 %vm90_vm0, %v2506_v34  ;;  %1976 = vmatmul.mubr.msk.bf16.gmra.mrb[8].mxu0 %vm90_vm0, %v2508_v35 }
  0x52   :  { %1904 = vmatpush3.bf16.msra.mxu1 %v2252_v4  ;;  %1891 = vmatprep.mubr.msk.bf16.mxu1 %vm90_vm0, %v2510_v36  ;;  %v2526_v4 = vpack.c.bf16 %v975_v41, %v974_v40 }
  0x53   :  { %1979 = vmatprep.mubr.msk.bf16.mxu0 %vm90_vm0, %v2512_v37  ;;  %1905 = vmatprep.subr.bf16.mxu1 %v2257_v5 }
  0x56   :  { %1906 = vmatpush3.bf16.msra.mxu1 %v2257_v5  ;;  %v2537_v5 = vpack.c.bf16 %v188_v49, %v187_v48 }
  0x57   :  { %1923 = vmatprep.subr.bf16.mxu1 %v2262_v6 }
  0x59   :  { %1892 = vmatmul.mubr.msk.bf16.gmra.mrb[4].mxu1 %vm90_vm0, %v2524_v45  ;;  %1980 = vmatmul.mubr.msk.bf16.gmra.mrb[12].mxu0 %vm90_vm0, %v2526_v4 }
  0x5a   :  { %1895 = vmatprep.mubr.msk.bf16.mxu1 %vm90_vm0, %v197_v47  ;;  %1987 = vmatprep.mubr.msk.bf16.mxu0 %vm90_vm0, %v2510_v36 }
  0x61   :  { %1896 = vmatmul.mubr.msk.bf16.gmra.mrb[8].mxu1 %vm90_vm0, %v2537_v5  ;;  %1988 = vmatmul.mubr.msk.bf16.vlgmr.msra.gmra.mrb[0].mxu0 %vm90_vm0, %v2524_v45 }
  0x62   :  { %1899 = vmatprep.mubr.msk.bf16.mxu1 %vm90_vm0, %v2539_v56  ;;  %2004 = vmatpush3.bf16.msra.mxu0 %v2302_v14  ;;  %v1136_v14 = vld [vmem:[#allocation3 + $0x140] sm:$0xff] }
  0x63   :  { %1991 = vmatprep.mubr.msk.bf16.mxu0 %vm90_vm0, %v2541_v57  ;;  %2005 = vmatprep.subr.bf16.mxu0 %v2307_v15  ;;  %v1146_v20 = vpack.c.bf16 %v1137_v19, %v1136_v14 }
  0x66   :  { %2006 = vmatpush3.bf16.msra.mxu0 %v2307_v15  ;;  %v1138_v15 = vld [vmem:[#allocation3 + $0x160] sm:$0xff] }
  0x67   :  { %2023 = vmatprep.subr.bf16.mxu0 %v2312_v16  ;;  %v1147_v26 = vpack.c.bf16 %v1139_v21, %v1138_v15 }
  0x69   :  { %1900 = vmatmul.mubr.msk.bf16.gmra.mrb[12].mxu1 %vm90_vm0, %v2553_v10  ;;  %1992 = vmatmul.mubr.msk.bf16.gmra.mrb[4].mxu0 %vm90_vm0, %v1143_v11 }
  0x6a   :  { %1907 = vmatprep.mubr.msk.bf16.mxu1 %vm90_vm0, %v487_v18  ;;  %1995 = vmatprep.mubr.msk.bf16.mxu0 %vm90_vm0, %v2539_v56 }
  0x71   :  { %1908 = vmatmul.mubr.msk.bf16.vlgmr.msra.gmra.mrb[0].mxu1 %vm90_vm0, %v2462_v55  ;;  %1996 = vmatmul.mubr.msk.bf16.gmra.mrb[8].mxu0 %vm90_vm0, %v2553_v10 }
  0x72   :  { %1924 = vmatpush3.bf16.msra.mxu1 %v2262_v6  ;;  %1911 = vmatprep.mubr.msk.bf16.mxu1 %vm90_vm0, %v2475_v1  ;;  %v1293_v6 = vld [vmem:[#allocation3 + $0xa2] sm:$0xff] }
  0x73   :  { %1999 = vmatprep.mubr.msk.bf16.mxu0 %vm90_vm0, %v1146_v20  ;;  %1925 = vmatprep.subr.bf16.mxu1 %v2267_v7 }
  0x76   :  { %1926 = vmatpush3.bf16.msra.mxu1 %v2267_v7  ;;  %v1294_v7 = vld [vmem:[#allocation3 + $0xb2] sm:$0xff] }
  0x77   :  { %2043 = vmatprep.subr.bf16.mxu1 %v2272_v8  ;;  %v1306_v55 = vpack.c.bf16 %v1294_v7, %v1293_v6 }
  0x79   :  { %1912 = vmatmul.mubr.msk.bf16.gmra.mrb[4].mxu1 %vm90_vm0, %v2479_v3  ;;  %2000 = vmatmul.mubr.msk.bf16.gmra.mrb[12].mxu0 %vm90_vm0, %v1147_v26 }
  0x7a   :  { %1915 = vmatprep.mubr.msk.bf16.mxu1 %vm90_vm0, %v491_v12  ;;  %2007 = vmatprep.mubr.msk.bf16.mxu0 %vm90_vm0, %v2441_v43  ;;  %v1300_v43 = vld [vmem:[#allocation3 + $0x152] sm:$0xff] }
  0x81   :  { %1916 = vmatmul.mubr.msk.bf16.gmra.mrb[8].mxu1 %vm90_vm0, %v2495_v27  ;;  %2008 = vmatmul.mubr.msk.bf16.vlgmr.msra.gmra.mrb[0].mxu0 %vm90_vm0, %v2444_v46 }
  0x82   :  { %1919 = vmatprep.mubr.msk.bf16.mxu1 %vm90_vm0, %v2508_v35  ;;  %2024 = vmatpush3.bf16.msra.mxu0 %v2312_v16  ;;  %v1299_v16 = vld [vmem:[#allocation3 + $0x142] sm:$0xff] }
  0x83   :  { %2011 = vmatprep.mubr.msk.bf16.mxu0 %vm90_vm0, %v2458_v53  ;;  %2025 = vmatprep.subr.bf16.mxu0 %v2317_v17  ;;  %v1309_v46 = vpack.c.bf16 %v1300_v43, %v1299_v16  ;;  %v1302_v53 = vld [vmem:[#allocation3 + $0x172] sm:$0xff] }
  0x86   :  { %2026 = vmatpush3.bf16.msra.mxu0 %v2317_v17  ;;  %v1301_v17 = vld [vmem:[#allocation3 + $0x162] sm:$0xff] }
  0x87   :  { %v1310_v27 = vpack.c.bf16 %v1302_v53, %v1301_v17 }
  0x89   :  { %1920 = vmatmul.mubr.msk.bf16.gmra.mrb[12].mxu1 %vm90_vm0, %v2512_v37  ;;  %2012 = vmatmul.mubr.msk.bf16.gmra.mrb[4].mxu0 %vm90_vm0, %v1306_v55 }
  0x8a   :  { %1927 = vmatprep.mubr.msk.bf16.mxu1 %vm90_vm0, %v2506_v34  ;;  %2015 = vmatprep.mubr.msk.bf16.mxu0 %vm90_vm0, %v2477_v2 }
  0x91   :  { %1928 = vmatmul.mubr.msk.bf16.vlgmr.msra.gmra.mrb[0].mxu1 %vm90_vm0, %v2510_v36  ;;  %2016 = vmatmul.mubr.msk.bf16.gmra.mrb[8].mxu0 %vm90_vm0, %v2491_v24 }
  0x92   :  { %2045 = vmatpush3.bf16.msra.mxu1 %v2272_v8  ;;  %1931 = vmatprep.mubr.msk.bf16.mxu1 %vm90_vm0, %v2524_v45  ;;  %v1456_v8 = vld [vmem:[#allocation3 + $0xa4] sm:$0xff] }
  0x93   :  { %2019 = vmatprep.mubr.msk.bf16.mxu0 %vm90_vm0, %v1309_v46  ;;  %2044 = vmatprep.subr.bf16.mxu1 %v2277_v9 }
  0x96   :  { %2046 = vmatpush3.bf16.msra.mxu1 %v2277_v9  ;;  %v1457_v9 = vld [vmem:[#allocation3 + $0xb4] sm:$0xff] }
  0x97   :  { %v1469_v28 = vpack.c.bf16 %v1457_v9, %v1456_v8 }
  0x99   :  { %1932 = vmatmul.mubr.msk.bf16.gmra.mrb[4].mxu1 %vm90_vm0, %v2541_v57  ;;  %2020 = vmatmul.mubr.msk.bf16.gmra.mrb[12].mxu0 %vm90_vm0, %v1310_v27 }
  0x9a   :  { %1935 = vmatprep.mubr.msk.bf16.mxu1 %vm90_vm0, %v2537_v5  ;;  %2027 = vmatprep.mubr.msk.bf16.mxu0 %vm90_vm0, %v2475_v1  ;;  %v1464_v1 = vld [vmem:[#allocation3 + $0x164] sm:$0xff] }
  0xa1   :  { %1936 = vmatmul.mubr.msk.bf16.gmra.mrb[8].mxu1 %vm90_vm0, %v2539_v56  ;;  %2028 = vmatmul.mubr.msk.bf16.vlgmr.msra.gmra.mrb[0].mxu0 %vm90_vm0, %v2479_v3  ;;  %v1465_v3 = vld [vmem:[#allocation3 + $0x174] sm:$0xff] }
  0xa2   :  { %1939 = vmatprep.mubr.msk.bf16.mxu1 %vm90_vm0, %v2553_v10  ;;  %2031 = vmatprep.mubr.msk.bf16.mxu0 %vm90_vm0, %v2493_v25  ;;  %v1473_v25 = vpack.c.bf16 %v1465_v3, %v1464_v1 }
  0xa9   :  { %1940 = vmatmul.mubr.msk.bf16.gmra.mrb[12].mxu1 %vm90_vm0, %v1146_v20  ;;  %2032 = vmatmul.mubr.msk.bf16.gmra.mrb[4].mxu0 %vm90_vm0, %v1469_v28 }
  0xaa   :  { %1955 = vmatprep.mubr.msk.bf16.mxu1 %vm90_vm0, %v2473_v0  ;;  %2035 = vmatprep.mubr.msk.bf16.mxu0 %vm90_vm0, %v2508_v35 }
  0xb1   :  { %1956 = vmatmul.mubr.msk.bf16.vlgmr.msra.gmra.mrb[8].mxu1 %vm90_vm0, %v2477_v2  ;;  %2036 = vmatmul.mubr.msk.bf16.gmra.mrb[8].mxu0 %vm90_vm0, %v2512_v37 }
  0xb2   :  { %1959 = vmatprep.mubr.msk.bf16.mxu1 %vm90_vm0, %v2491_v24  ;;  %2039 = vmatprep.mubr.msk.bf16.mxu0 %vm90_vm0, %v2526_v4  ;;  %v2642_v24 = vld [vmem:[%s2690_s2] ss:$0 sm:$0xff]  ;;  %s2206_s2 = smov [#allocation5]  }
  0xb3   :  { %s1674_s25 = sshll.u32 %s2206_s2, 4  ;;  %s1675_s25 = int_to_ptr.vmem [resolvable:$true] %s1674_s25 }
  0xb4   :  { %s2179_s26 = scalar_lea.vmem %s1675_s25, 2048  ;;  %p2184_p1 = scmp.lt.s32.totalorder %s1675_s25, %s1675_s25 }
  0xb5   :  { %p2180_p0 = scmp.ne.s32.totalorder %s1675_s25, %s2179_s26  ;;  %p2185_p2 = scmp.lt.s32.totalorder %s2179_s26, %s2179_s26 }
  0xb7   :  { %p2186_p3 = por %p2185_p2, %p2184_p1 }
  0xb9   :  { %1960 = vmatmul.mubr.msk.bf16.gmra.mrb[12].mxu1 %vm90_vm0, %v1309_v46  ;;  %2040 = vmatmul.mubr.msk.bf16.gmra.mrb[12].mxu0 %vm90_vm0, %v1473_v25  ;;  %p2187_p4 = pnand %p2186_p3, %p2180_p0 }
 0x164   :  { %v1929_v0 = vpop.f32.mrb[0].mxu1 }
 0x165   :  { %v718_v29 = vpop.f32.mrb[1].mxu1 }
 0x166   :  { %v1930_v30 = vpop.f32.mrb[2].mxu1 }
 0x167   :  { %v721_v2 = vpop.f32.mrb[3].mxu1 }
 0x16c   :  { %v1933_v31 = vpop.f32.mrb[4].mxu1 }
 0x16d   :  { %v734_v32 = vpop.f32.mrb[5].mxu1 }
 0x16e   :  { %v1934_v13 = vpop.f32.mrb[6].mxu1 }
 0x16f   :  { %v737_v33 = vpop.f32.mrb[7].mxu1 }
 0x174   :  { %v2029_v34 = vpop.f32.mrb[0].mxu0 }
 0x175   :  { %v2047_v35 = vadd.f32 %v2029_v34, %v1929_v0  ;;  %v1534_v36 = vpop.f32.mrb[1].mxu0 }
 0x176   :  { %v2048_v37 = vadd.f32 %v1534_v36, %v718_v29  ;;  %v2030_v38 = vpop.f32.mrb[2].mxu0 }
 0x177   :  { %v1622_v39 = vadd.f32 %v2047_v35, %v2642_v24  ;;  %v2049_v40 = vadd.f32 %v2030_v38, %v1930_v30  ;;  %v1537_v41 = vpop.f32.mrb[3].mxu0 }
 0x178   :  { %v1620_v42 = vadd.f32 %v2048_v37, %v2642_v24  ;;  %v2050_v44 = vadd.f32 %v1537_v41, %v721_v2 }
 0x179   :  { %v1638_v45 = vmax.f32 %v1622_v39, 0.0  ;;  %v1623_v4 = vadd.f32 %v2049_v40, %v2642_v24 }
 0x17a   :  { %v1636_v47 = vmax.f32 %v1620_v42, 0.0  ;;  %v1621_v48 = vadd.f32 %v2050_v44, %v2642_v24 }
 0x17b   :  { %1655 = vst.msk [vmem:[#allocation5 + $0x10] sm:$0xff] %vm1652_vm2, %v1638_v45  ;;  %v1639_v49 = vmax.f32 %v1623_v4, 0.0 }
 0x17c   :  { %1653 = vst.msk [vmem:[#allocation5] sm:$0xff] %vm1652_vm2, %v1636_v47  ;;  %v1637_v50 = vmax.f32 %v1621_v48, 0.0  ;;  %v2033_v51 = vpop.f32.mrb[4].mxu0 }
 0x17d   :  { %1656 = vst.msk [vmem:[#allocation5 + $0x18] sm:$0xff] %vm1652_vm2, %v1639_v49  ;;  %v2051_v52 = vadd.f32 %v2033_v51, %v1933_v31  ;;  %v1550_v54 = vpop.f32.mrb[5].mxu0 }
 0x17e   :  { %1654 = vst.msk [vmem:[#allocation5 + $0x8] sm:$0xff] %vm1652_vm2, %v1637_v50  ;;  %v2052_v5 = vadd.f32 %v1550_v54, %v734_v32  ;;  %v2034_v56 = vpop.f32.mrb[6].mxu0 }
 0x17f   :  { %v1626_v57 = vadd.f32 %v2051_v52, %v2642_v24  ;;  %v2053_v58 = vadd.f32 %v2034_v56, %v1934_v13  ;;  %v1553_v59 = vpop.f32.mrb[7].mxu0 }
 0x180   :  { %v1624_v60 = vadd.f32 %v2052_v5, %v2642_v24  ;;  %v2054_v61 = vadd.f32 %v1553_v59, %v737_v33 }
 0x181   :  { %v1642_v62 = vmax.f32 %v1626_v57, 0.0  ;;  %v1627_v63 = vadd.f32 %v2053_v58, %v2642_v24 }
 0x182   :  { %v1640_v10 = vmax.f32 %v1624_v60, 0.0  ;;  %v1625_v11 = vadd.f32 %v2054_v61, %v2642_v24 }
 0x183   :  { %1659 = vst.msk [vmem:[#allocation5 + $0x30] sm:$0xff] %vm1652_vm2, %v1642_v62  ;;  %v1643_v18 = vmax.f32 %v1627_v63, 0.0 }
 0x184   :  { %v1957_v14 = vpop.f32.mrb[8].mxu1  ;;  %1657 = vst.msk [vmem:[#allocation5 + $0x20] sm:$0xff] %vm1652_vm2, %v1640_v10  ;;  %v1641_v19 = vmax.f32 %v1625_v11, 0.0  ;;  %v2037_v20 = vpop.f32.mrb[8].mxu0 }
 0x185   :  { %v913_v15 = vpop.f32.mrb[9].mxu1  ;;  %1660 = vst.msk [vmem:[#allocation5 + $0x38] sm:$0xff] %vm1652_vm2, %v1643_v18  ;;  %v2055_v21 = vadd.f32 %v2037_v20, %v1957_v14  ;;  %v1566_v22 = vpop.f32.mrb[9].mxu0 }
 0x186   :  { %v1958_v23 = vpop.f32.mrb[10].mxu1  ;;  %1658 = vst.msk [vmem:[#allocation5 + $0x28] sm:$0xff] %vm1652_vm2, %v1641_v19  ;;  %v2056_v26 = vadd.f32 %v1566_v22, %v913_v15  ;;  %v2038_v12 = vpop.f32.mrb[10].mxu0 }
 0x187   :  { %v916_v6 = vpop.f32.mrb[11].mxu1  ;;  %v1630_v7 = vadd.f32 %v2055_v21, %v2642_v24  ;;  %v2057_v55 = vadd.f32 %v2038_v12, %v1958_v23  ;;  %v1569_v16 = vpop.f32.mrb[11].mxu0 }
 0x188   :  { %v1628_v43 = vadd.f32 %v2056_v26, %v2642_v24  ;;  %v2058_v46 = vadd.f32 %v1569_v16, %v916_v6 }
 0x189   :  { %v1646_v17 = vmax.f32 %v1630_v7, 0.0  ;;  %v1631_v53 = vadd.f32 %v2057_v55, %v2642_v24 }
 0x18a   :  { %v1644_v27 = vmax.f32 %v1628_v43, 0.0  ;;  %v1629_v8 = vadd.f32 %v2058_v46, %v2642_v24 }
 0x18b   :  { %1663 = vst.msk [vmem:[#allocation5 + $0x50] sm:$0xff] %vm1652_vm2, %v1646_v17  ;;  %v1647_v9 = vmax.f32 %v1631_v53, 0.0 }
 0x18c   :  { %v1961_v28 = vpop.f32.mrb[12].mxu1  ;;  %1661 = vst.msk [vmem:[#allocation5 + $0x40] sm:$0xff] %vm1652_vm2, %v1644_v27  ;;  %v1645_v1 = vmax.f32 %v1629_v8, 0.0  ;;  %v2041_v3 = vpop.f32.mrb[12].mxu0 }
 0x18d   :  { %v929_v25 = vpop.f32.mrb[13].mxu1  ;;  %1664 = vst.msk [vmem:[#allocation5 + $0x58] sm:$0xff] %vm1652_vm2, %v1647_v9  ;;  %v2059_v0 = vadd.f32 %v2041_v3, %v1961_v28  ;;  %v1582_v29 = vpop.f32.mrb[13].mxu0 }
 0x18e   :  { %v1962_v30 = vpop.f32.mrb[14].mxu1  ;;  %1662 = vst.msk [vmem:[#allocation5 + $0x48] sm:$0xff] %vm1652_vm2, %v1645_v1  ;;  %v2060_v2 = vadd.f32 %v1582_v29, %v929_v25  ;;  %v2042_v31 = vpop.f32.mrb[14].mxu0 }
 0x18f   :  { %v932_v32 = vpop.f32.mrb[15].mxu1  ;;  %v1634_v13 = vadd.f32 %v2059_v0, %v2642_v24  ;;  %v2061_v33 = vadd.f32 %v2042_v31, %v1962_v30  ;;  %v1585_v34 = vpop.f32.mrb[15].mxu0 }
 0x190   :  { %v1632_v35 = vadd.f32 %v2060_v2, %v2642_v24  ;;  %v2062_v36 = vadd.f32 %v1585_v34, %v932_v32 }
 0x191   :  { %v1650_v37 = vmax.f32 %v1634_v13, 0.0  ;;  %v1635_v38 = vadd.f32 %v2061_v33, %v2642_v24 }
 0x192   :  { %v1648_v39 = vmax.f32 %v1632_v35, 0.0  ;;  %v1633_v40 = vadd.f32 %v2062_v36, %v2642_v24 }
 0x193   :  { %1667 = vst.msk [vmem:[#allocation5 + $0x70] sm:$0xff] %vm1652_vm2, %v1650_v37  ;;  %v1651_v41 = vmax.f32 %v1635_v38, 0.0 }
 0x194   :  { %1665 = vst.msk [vmem:[#allocation5 + $0x60] sm:$0xff] %vm1652_vm2, %v1648_v39  ;;  %v1649_v42 = vmax.f32 %v1633_v40, 0.0 }
 0x195   :  { %1668 = vst.msk [vmem:[#allocation5 + $0x78] sm:$0xff] %vm1652_vm2, %v1651_v41 }
 0x196   :  { %1666 = vst.msk [vmem:[#allocation5 + $0x68] sm:$0xff] %vm1652_vm2, %v1649_v42 }
 0x197   :  { %2190 = shalt.err (!%p2187_p4)
}
 0x198   :  { %s2191_s29 = scalar_lea.hbm %s2691_s3, 2048 }
 0x199   :  { %p2192_p5 = scmp.ne.s32.totalorder %s2691_s3, %s2191_s29  ;;  %p2195_p6 = scmp.lt.u32.totalorder %s2191_s29, %s2691_s3 }
 0x19b   :  { %p2197_p7 = pnand %p2195_p6, %p2192_p5 }
 0x19d   :  { %2200 = shalt.err (!%p2197_p7)
}
 0x19e   :  { %s2207_s7 = smov 128   ;;  %s2208_s8 = smov 8  }
 0x19f   :  { %1680 = dma.vmem_to_hbm [thread:$0]  %s1675_s25, 2048, %s2691_s3, [#allocation6], %s2207_s7, %s2207_s7, %s2208_s8  }
 0x1a0   :  { %2203 = dma.done.wait [#allocation6], 2048  }
 0x1a1   :  { %2204 = vsyncadd [#allocation6], 4294965248 }
 0x1a2   :  { %1684 = vsyncpa [#allocation6], 1 }
 0x1a3   :  { %1685 = vsyncmov [#allocation4] }
 0x1a6   :  { %s1686_s11 = vpop.sfrf %1685 }
 0x1a7   :  { %p1772_p8 = scmp.ne.s32.totalorder %s1686_s11, 0 }
 0x1a9   :  { %1690 = shalt.err (%p1772_p8)  }

</bundles_post_ra>
